<compile_context>
chip_gen: v7x
topology: tpu7x:2x2x1
jax: 0.10.0
libtpu: 0.0.40
codegen_flags: <defaults>
</compile_context>

<pallas_src>
import jax
import jax.numpy as jnp
from jax.experimental import pallas as pl
from jax.experimental.pallas import tpu as pltpu


def ffn_kernel(x_ref, w_in_t_ref, w_gate_t_ref, w_hidden_t_ref, o_ref):
    # x arrives in its native dtype; cast to bf16 in-kernel (cheap VPU pack).
    x = x_ref[...].astype(jnp.bfloat16)                                         # (tm, D)

    # hidden = dropout(relu(linear_in(x)))  -- dropout == identity at inference.
    h32 = jnp.dot(x, w_in_t_ref[...], preferred_element_type=jnp.float32)       # (tm, H) f32
    h32 = jnp.maximum(h32, 0.0)                                                  # ReLU in f32 (VPU)
    h = h32.astype(jnp.bfloat16)                                                 # bf16 feed for MXU

    # gate = linear_gate(hidden)   (requires H == D, as in the PyTorch module)
    g32 = jnp.dot(h, w_gate_t_ref[...], preferred_element_type=jnp.float32)      # (tm, H) f32

    # out = linear_hidden(hidden * gate)
    hg = (h32 * g32).astype(jnp.bfloat16)                                        # f32 elementwise, bf16 for MXU
    out = jnp.dot(hg, w_hidden_t_ref[...], preferred_element_type=jnp.float32)   # (tm, D) f32

    o_ref[...] = out.astype(o_ref.dtype)                                          # bf16 store (lane-dense)


def prepare_ffn_params(w_in, w_gate, w_hidden):
    """One-time layout prep (per weight update / module init), NOT per forward call.

    Takes PyTorch nn.Linear weights (out_features, in_features) and returns
    pre-transposed bf16 weights so each in-kernel matmul is a natural (tm,K)@(K,N).
    """
    w_in_t = jnp.transpose(w_in).astype(jnp.bfloat16)        # (D, H)
    w_gate_t = jnp.transpose(w_gate).astype(jnp.bfloat16)    # (D, H) == (H, H)
    w_hidden_t = jnp.transpose(w_hidden).astype(jnp.bfloat16)  # (H, D)
    return w_in_t, w_gate_t, w_hidden_t


def _vmem_budget_bytes():
    """Usable per-core VMEM budget, with headroom for Mosaic internal scratch."""
    try:
        cap = pltpu.get_tpu_info().vmem_capacity_bytes
    except Exception:
        cap = 64 << 20  # conservative (v7x)
    return min(cap, 64 << 20) - (8 << 20)


def _choose_tm(M, D, H):
    """Row tile: largest multiple of 16 dividing M that (a) fits the VMEM budget
    alongside the resident weights and (b) leaves >= 4 grid steps when M allows
    (>= 2 steps per TensorCore under v7x megacore sharding)."""
    sub = 16  # bf16 sublane packing for the output tile
    budget = _vmem_budget_bytes()
    resident_weights = 3 * D * H * 2
    # per-row VMEM: double-buffered f32 x tile + double-buffered bf16 out tile + f32 h/g/hg.
    per_row = 2 * D * 4 + 2 * D * 2 + 3 * H * 4
    avail = max(budget - resident_weights, sub * per_row)
    vmem_tm = max(sub, (avail // per_row) // sub * sub)
    cap = min(M, 2048, vmem_tm)
    if M >= 4 * sub:
        cap = min(cap, max(sub, (M // 4) // sub * sub))
    for tm in range(cap, sub - 1, -1):
        if M % tm == 0 and tm % sub == 0:
            return tm
    return M  # tiny / odd M: single full-extent block


def _vmem_limit_bytes(tm, D, H, x_itemsize):
    act = 2 * (tm * D * x_itemsize) + 2 * (tm * D * 2)   # double-buffered x tile + bf16 out tile
    weights = 3 * D * H * 2                               # resident bf16 weights (Buffered(1))
    interm = 3 * tm * H * 4                               # f32 h / g / h*g
    est = act + weights + interm + (8 << 20)              # Mosaic internal-scratch headroom
    return int(min(56 << 20, est))


def feed_forward(x, params, *, tm=None):
    """x: (B, S, D) float32/bf16. params: output of prepare_ffn_params (pre-transposed bf16)."""
    w_in_t, w_gate_t, w_hidden_t = params
    B, S, D = x.shape
    D_in, H = w_in_t.shape
    assert D_in == D
    assert w_gate_t.shape == (D, H) and w_hidden_t.shape == (H, D)
    assert H == D, "PyTorch module's forward requires hidden_dim == input_dim"
    assert D % 128 == 0 and H % 128 == 0, "feature dims must be lane-dense (multiples of 128)"
    # TODO(synk): if resident bf16 weights exceed the VMEM budget, use the H-streamed path.
    assert 3 * D * H * 2 <= _vmem_budget_bytes(), "weights too large for resident path"

    M = B * S
    if tm is None:
        tm = _choose_tm(M, D, H)
    assert M % tm == 0, "tm must divide B*S"
    assert tm == M or tm % 16 == 0, "row tile must be a multiple of 16 (bf16 sublane packing)"

    x2 = x.reshape(M, D)  # free relayout: no dtype cast in the wrapper
    x_itemsize = jnp.dtype(x.dtype).itemsize

    grid = (M // tm,)
    resident = pl.Buffered(1)  # constant index_map -> single resident buffer per weight

    cost = pl.CostEstimate(
        flops=2 * M * D * H + 2 * M * H * H + 2 * M * H * D,
        transcendentals=0,
        bytes_accessed=M * D * x_itemsize + 3 * D * H * 2 + M * D * 2,
    )

    out = pl.pallas_call(
        ffn_kernel,
        out_shape=jax.ShapeDtypeStruct((M, D), jnp.bfloat16),
        grid_spec=pltpu.PrefetchScalarGridSpec(
            num_scalar_prefetch=0,
            grid=grid,
            in_specs=[
                pl.BlockSpec((tm, D), lambda i: (i, 0)),                            # x row-tile
                pl.BlockSpec((D, H), lambda i: (0, 0), pipeline_mode=resident),     # W_in^T
                pl.BlockSpec((D, H), lambda i: (0, 0), pipeline_mode=resident),     # W_gate^T
                pl.BlockSpec((H, D), lambda i: (0, 0), pipeline_mode=resident),     # W_hidden^T
            ],
            out_specs=pl.BlockSpec((tm, D), lambda i: (i, 0)),
        ),
        compiler_params=pltpu.CompilerParams(
            dimension_semantics=("parallel",),
            vmem_limit_bytes=_vmem_limit_bytes(tm, D, H, x_itemsize),
        ),
        cost_estimate=cost,
    )(x2, w_in_t, w_gate_t, w_hidden_t)

    return out.reshape(B, S, D)


def reference(x, w_in, w_gate, w_hidden):
    """Same math with the same bf16 casts, in plain jnp (PyTorch nn.Linear convention)."""
    xb = x.astype(jnp.bfloat16)
    wi = w_in.astype(jnp.bfloat16)
    wg = w_gate.astype(jnp.bfloat16)
    wh = w_hidden.astype(jnp.bfloat16)
    h32 = jnp.maximum(
        jnp.einsum("bsd,hd->bsh", xb, wi, preferred_element_type=jnp.float32), 0.0
    )
    hb = h32.astype(jnp.bfloat16)
    g32 = jnp.einsum("bsh,gh->bsg", hb, wg, preferred_element_type=jnp.float32)
    hg = (h32 * g32).astype(jnp.bfloat16)
    out = jnp.einsum("bsh,dh->bsd", hg, wh, preferred_element_type=jnp.float32)
    return out.astype(jnp.bfloat16)


if __name__ == "__main__":
    B, S = 2, 256
    input_dim = 256
    hidden_dim = 256  # must equal input_dim for the PyTorch forward to be well-formed

    key = jax.random.PRNGKey(0)
    kx, k1, k2, k3 = jax.random.split(key, 4)

    x = jax.random.normal(kx, (B, S, input_dim), dtype=jnp.float32)
    # PyTorch nn.Linear weight shape: (out_features, in_features)
    w_in = jax.random.normal(k1, (hidden_dim, input_dim), dtype=jnp.float32) * 0.05
    w_gate = jax.random.normal(k2, (hidden_dim, input_dim), dtype=jnp.float32) * 0.05
    w_hidden = jax.random.normal(k3, (input_dim, hidden_dim), dtype=jnp.float32) * 0.05

    # One-time weight layout prep (not in the per-call hot path).
    params = prepare_ffn_params(w_in, w_gate, w_hidden)
    params = jax.block_until_ready(params)

    out = feed_forward(x, params)
    out = jax.block_until_ready(out)

    ref = reference(x, w_in, w_gate, w_hidden)
    assert out.shape == (B, S, input_dim)
    assert out.dtype == jnp.bfloat16
    assert jnp.allclose(
        out.astype(jnp.float32), ref.astype(jnp.float32), atol=2e-2, rtol=2e-2
    ), "mismatch vs reference"

    print("KERNEL_OK")
</pallas_src>

<mosaic_0001>
module attributes {stable_mosaic.version = 11 : i64} {
  func.func @ffn_kernel(%arg0: i32, %arg1: memref<128x256xf32, #tpu.memory_space<vmem>>, %arg2: memref<256x256xbf16, #tpu.memory_space<vmem>>, %arg3: memref<256x256xbf16, #tpu.memory_space<vmem>>, %arg4: memref<256x256xbf16, #tpu.memory_space<vmem>>, %arg5: memref<128x256xbf16, #tpu.memory_space<vmem>>) attributes {dimension_semantics = [#tpu.dimension_semantics<parallel>], iteration_bounds = array<i64: 4>, scalar_prefetch = 0 : i64, scratch_operands = 0 : i64, tpu.core_type = #tpu.core_type<tc>, window_params = [{transform_indices = @transform_0, window_bounds = array<i64: 128, 256>}, {pipeline_mode = #tpu.pipeline_mode<synchronous>, transform_indices = @transform_1, window_bounds = array<i64: 256, 256>}, {pipeline_mode = #tpu.pipeline_mode<synchronous>, transform_indices = @transform_2, window_bounds = array<i64: 256, 256>}, {pipeline_mode = #tpu.pipeline_mode<synchronous>, transform_indices = @transform_3, window_bounds = array<i64: 256, 256>}, {transform_indices = @transform_4, window_bounds = array<i64: 128, 256>}]} {
    %c0 = arith.constant 0 : index
    %c0_0 = arith.constant 0 : index
    %0 = vector.load %arg1[%c0, %c0_0] : memref<128x256xf32, #tpu.memory_space<vmem>>, vector<128x256xf32>
    %1 = arith.truncf %0 : vector<128x256xf32> to vector<128x256xbf16>
    %c0_1 = arith.constant 0 : index
    %c0_2 = arith.constant 0 : index
    %2 = vector.load %arg2[%c0_1, %c0_2] : memref<256x256xbf16, #tpu.memory_space<vmem>>, vector<256x256xbf16>
    %cst = arith.constant dense<0.000000e+00> : vector<128x256xf32>
    %3 = tpu.matmul %1, %2, %cst {dimension_numbers = #tpu.dot_dimension_numbers<[1], [0], [0], [1], [0, 0, 1, 1], [], []>} : vector<128x256xbf16>, vector<256x256xbf16>, vector<128x256xf32> -> vector<128x256xf32>
    %cst_3 = arith.constant 0.000000e+00 : f32
    %4 = vector.broadcast %cst_3 : f32 to vector<128x256xf32>
    %5 = arith.maximumf %3, %4 : vector<128x256xf32>
    %6 = arith.truncf %5 : vector<128x256xf32> to vector<128x256xbf16>
    %c0_4 = arith.constant 0 : index
    %c0_5 = arith.constant 0 : index
    %7 = vector.load %arg3[%c0_4, %c0_5] : memref<256x256xbf16, #tpu.memory_space<vmem>>, vector<256x256xbf16>
    %cst_6 = arith.constant dense<0.000000e+00> : vector<128x256xf32>
    %8 = tpu.matmul %6, %7, %cst_6 {dimension_numbers = #tpu.dot_dimension_numbers<[1], [0], [0], [1], [0, 0, 1, 1], [], []>} : vector<128x256xbf16>, vector<256x256xbf16>, vector<128x256xf32> -> vector<128x256xf32>
    %9 = arith.mulf %5, %8 : vector<128x256xf32>
    %10 = arith.truncf %9 : vector<128x256xf32> to vector<128x256xbf16>
    %c0_7 = arith.constant 0 : index
    %c0_8 = arith.constant 0 : index
    %11 = vector.load %arg4[%c0_7, %c0_8] : memref<256x256xbf16, #tpu.memory_space<vmem>>, vector<256x256xbf16>
    %cst_9 = arith.constant dense<0.000000e+00> : vector<128x256xf32>
    %12 = tpu.matmul %10, %11, %cst_9 {dimension_numbers = #tpu.dot_dimension_numbers<[1], [0], [0], [1], [0, 0, 1, 1], [], []>} : vector<128x256xbf16>, vector<256x256xbf16>, vector<128x256xf32> -> vector<128x256xf32>
    %13 = arith.truncf %12 : vector<128x256xf32> to vector<128x256xbf16>
    %c0_10 = arith.constant 0 : index
    %c0_11 = arith.constant 0 : index
    %14 = vector.load %arg5[%c0_10, %c0_11] : memref<128x256xbf16, #tpu.memory_space<vmem>>, vector<128x256xbf16>
    tpu.vector_store %arg5[%c0_10, %c0_11], %13 {strides = array<i32>} : memref<128x256xbf16, #tpu.memory_space<vmem>>, vector<128x256xbf16>,
    return
  }
  func.func @transform_0(%arg0: i32) -> (i32, i32) {
    %c0_i32 = arith.constant 0 : i32
    %c0_i32_0 = arith.constant 0 : i32
    return %arg0, %c0_i32 : i32, i32
  }
  func.func @transform_1(%arg0: i32) -> (i32, i32) {
    %c0_i32 = arith.constant 0 : i32
    %c0_i32_0 = arith.constant 0 : i32
    %c0_i32_1 = arith.constant 0 : i32
    return %c0_i32, %c0_i32_0 : i32, i32
  }
  func.func @transform_2(%arg0: i32) -> (i32, i32) {
    %c0_i32 = arith.constant 0 : i32
    %c0_i32_0 = arith.constant 0 : i32
    %c0_i32_1 = arith.constant 0 : i32
    return %c0_i32, %c0_i32_0 : i32, i32
  }
  func.func @transform_3(%arg0: i32) -> (i32, i32) {
    %c0_i32 = arith.constant 0 : i32
    %c0_i32_0 = arith.constant 0 : i32
    %c0_i32_1 = arith.constant 0 : i32
    return %c0_i32, %c0_i32_0 : i32, i32
  }
  func.func @transform_4(%arg0: i32) -> (i32, i32) {
    %c0_i32 = arith.constant 0 : i32
    %c0_i32_0 = arith.constant 0 : i32
    return %arg0, %c0_i32 : i32, i32
  }
}

</mosaic_0001>

<bundles_post_ra>
// kernel: tpu_custom_call.1
= control target key start
LH: loop header
LB: loop body
LE: loop exit
PB: predicated region body
PF: predicated region fallthrough
CT: control target
= control target key end

     0   :  { %9 = vsyncpa [#allocation3], 0  ;;  %s2842_s0 = inlined_call_operand.hbm [shape: f32[512,256], index: 0, kind: input, shape index: {}]   ;;  %s2843_s1 = inlined_call_operand.hbm [shape: bf16[256,256], index: 1, kind: input, shape index: {}]   ;;  %s2844_s2 = inlined_call_operand.hbm [shape: bf16[256,256], index: 2, kind: input, shape index: {}]   ;;  %s2845_s3 = inlined_call_operand.hbm [shape: bf16[256,256], index: 3, kind: input, shape index: {}]   ;;  %s2846_s4 = inlined_call_operand.hbm [shape: bf16[512,256], index: 4, kind: output, shape index: {}]  }
   0x1   :  { %11 = vsyncpa [#allocation3 + $0x1], 0 }
   0x2   :  { %12 = vsyncpa [#allocation6], 0 }
   0x3   :  { %13 = vsyncpa [#allocation9], 0 }
   0x4   :  { %14 = vsyncpa [#allocation4], 0 }
   0x5   :  { %16 = vsyncpa [#allocation4 + $0x1], 0  ;;  %s2190_s15 = smov 0   ;;  %s2192_s16 = smov 0  }
   0x6   :  { %s2194_s17 = smov 0   ;;  %s2196_s18 = smov 0  }
   0x7 LB: > { %s2211_s19 = sadd.s32 4294967295, %s2152_s18   ;;  %s1551_s20 = sadd.s32 4294967294, %s2152_s18   ;;  %s2152_s18 = sphi %s2196_s18, %s2894_s18   ;;  %s2148_s17 = sphi %s2194_s17, %s2893_s17   ;;  %s2144_s16 = sphi %s2192_s16, %s2892_s16   ;;  %s2140_s15 = sphi %s2190_s15, %s2891_s15  }
   0x8   : > { %p42_p0 = scmp.ne.s32.totalorder %s2144_s16, %s2140_s15  ;;  %p2847_p1 = scmp.eq.s32.totalorder %s2211_s19, 0 }
   0x9   : > { %p135_p3 = scmp.eq.s32.totalorder %s1551_s20, 3  ;;  %p1552_p5 = scmp.ge.s32.totalorder %s2152_s18, 1 }
   0xa   : > { %p2220_p4 = por %p2847_p1, %p42_p0  ;;  %p142_p7 = scmp.lt.s32.totalorder %s2152_s18, 5 }
   0xb   : > { %p2225_p6 = por %p135_p3, %p42_p0  ;;  %s2154_s24 = smov [#allocation5]  }
   0xc   : > { %s2863_s21 = scalar_select %p2220_p4, 1, 0 }
   0xd   : > { %s2864_s22 = scalar_select %p2225_p6, 1, 0 }
   0xe   : > { %p2230_p8 = pnand %p1552_p5, %p142_p7  ;;  %s154_s25 = sshll.u32 %s2154_s24, 4  ;;  %s2234_s25 = int_to_ptr.vmem [resolvable:$true] %s154_s25 }
   0xf   : > { %s2155_s27 = smov [#allocation7]   ;;  %s2156_s29 = smov [#allocation8]  }
  0x10   : > { %s2865_s23 = scalar_select %p2230_p8, 1, 0 }
  0x11   : > { %p1753_p9 = pneg %p2230_p8  ;;  %s167_s28 = sshll.u32 %s2155_s27, 4  ;;  %s2244_s28 = int_to_ptr.vmem [resolvable:$true] %s167_s28 }
  0x12   : > { %s2246_s30 = sshll.u32 %s2156_s29, 4  ;;  %s1964_s7 = scalar_lea.hbm %s2843_s1, 4096  ;;  %s181_s30 = int_to_ptr.vmem [resolvable:$true] %s2246_s30 }
  0x13   : > { %p2240_p10 = pnand %p1753_p9, %p2847_p1  ;;  %p1965_p11 = scmp.ne.s32.totalorder %s2843_s1, %s1964_s7 }
  0x14   : > { %p1971_p3 = scmp.lt.u32.totalorder %s1964_s7, %s2843_s1 }
  0x15   : > { %p2256_p12 = pneg %p2240_p10 }
  0x17   : > { %p1967_p13 = pnand %p2256_p12, %p1965_p11 }
  0x19   : > { %p1968_p0 = pneg %p1967_p13 }
  0x1b   : > { %p1973_p5 = pnand %p1971_p3, %p1968_p0 }
  0x1d   : > { %1976 = shalt.err (!%p1973_p5)
}
  0x1e   : > { %s1977_s13 = scalar_lea.vmem %s2234_s25, 4096  ;;  %p1985_p2 = scmp.lt.s32.totalorder %s2234_s25, %s2234_s25 }
  0x1f   : > { %p1978_p7 = scmp.ne.s32.totalorder %s2234_s25, %s1977_s13  ;;  %p1986_p6 = scmp.lt.s32.totalorder %s1977_s13, %s1977_s13 }
  0x21   : > { %p1980_p9 = pnand %p1978_p7, %p2256_p12  ;;  %p1987_p11 = por %p1986_p6, %p1985_p2 }
  0x23   : > { %p1981_p1 = pneg %p1980_p9 }
  0x25   : > { %p1988_p13 = pnand %p1987_p11, %p1981_p1 }
  0x27   : > { %1991 = shalt.err (!%p1988_p13)
}
  0x28   : > { %s2157_s14 = smov 128   ;;  %s2158_s20 = smov 8  }
  0x29   : > { %1756 = dma.hbm_to_vmem [thread:$0]  (!%p2240_p10), %s2843_s1, 4096, %s2234_s25, [#allocation6], %s2157_s14, %s2157_s14, %s2158_s20  }
  0x2a   : > { %s1992_s6 = scalar_lea.hbm %s2844_s2, 4096 }
  0x2b   : > { %p1993_p1 = scmp.ne.s32.totalorder %s2844_s2, %s1992_s6  ;;  %p1999_p0 = scmp.lt.u32.totalorder %s1992_s6, %s2844_s2 }
  0x2d   : > { %p1995_p2 = pnand %p1993_p1, %p2256_p12 }
  0x2f   : > { %p1996_p6 = pneg %p1995_p2 }
  0x31   : > { %p2001_p3 = pnand %p1999_p0, %p1996_p6 }
  0x33   : > { %2004 = shalt.err (!%p2001_p3)
}
  0x34   : > { %s2005_s25 = scalar_lea.vmem %s2244_s28, 4096  ;;  %p2013_p11 = scmp.lt.s32.totalorder %s2244_s28, %s2244_s28 }
  0x35   : > { %p2006_p5 = scmp.ne.s32.totalorder %s2244_s28, %s2005_s25  ;;  %p2014_p13 = scmp.lt.s32.totalorder %s2005_s25, %s2005_s25 }
  0x37   : > { %p2008_p7 = pnand %p2006_p5, %p2256_p12  ;;  %p2015_p1 = por %p2014_p13, %p2013_p11 }
  0x39   : > { %p2009_p9 = pneg %p2008_p7 }
  0x3b   : > { %p2016_p2 = pnand %p2015_p1, %p2009_p9 }
  0x3d   : > { %2019 = shalt.err (!%p2016_p2)
}
  0x3e   : > { %1759 = dma.hbm_to_vmem [thread:$0]  (!%p2240_p10), %s2844_s2, 4096, %s2244_s28, [#allocation6], %s2157_s14, %s2157_s14, %s2158_s20  }
  0x3f   : > { %s2020_s29 = scalar_lea.hbm %s2845_s3, 4096 }
  0x40   : > { %p2021_p6 = scmp.ne.s32.totalorder %s2845_s3, %s2020_s29  ;;  %p2027_p5 = scmp.lt.u32.totalorder %s2020_s29, %s2845_s3 }
  0x42   : > { %p2023_p0 = pnand %p2021_p6, %p2256_p12 }
  0x44   : > { %p2024_p3 = pneg %p2023_p0 }
  0x46   : > { %p2029_p7 = pnand %p2027_p5, %p2024_p3 }
  0x48   : > { %2032 = shalt.err (!%p2029_p7)
}
  0x49   : > { %s2033_s9 = scalar_lea.vmem %s181_s30, 4096  ;;  %p2041_p1 = scmp.lt.s32.totalorder %s181_s30, %s181_s30 }
  0x4a   : > { %p2034_p9 = scmp.ne.s32.totalorder %s181_s30, %s2033_s9  ;;  %p2042_p2 = scmp.lt.s32.totalorder %s2033_s9, %s2033_s9 }
  0x4c   : > { %p2036_p11 = pnand %p2034_p9, %p2256_p12  ;;  %p2043_p4 = por %p2042_p2, %p2041_p1 }
  0x4e   : > { %p2037_p13 = pneg %p2036_p11 }
  0x50   : > { %p2044_p8 = pnand %p2043_p4, %p2037_p13 }
  0x52   : > { %2047 = shalt.err (!%p2044_p8)
}
  0x53   : > { %1762 = dma.hbm_to_vmem [thread:$0]  (!%p2240_p10), %s2845_s3, 4096, %s181_s30, [#allocation9], %s2157_s14, %s2157_s14, %s2158_s20  }
  0x54   : > { %s2329_s10 = sadd.s32 1, %s2152_s18   ;;  %s29_s25 = sadd.s32 1, %s2148_s17 }
  0x55   : > { %s26_s26 = ssub.s32 %s2152_s18, %s2329_s10  ;;  %p36_p8 = scmp.ne.s32.totalorder %s2148_s17, %s2144_s16 }
  0x56   : > { %p27_p4 = scmp.eq.s32.totalorder %s26_s26, 0  ;;  %p37_p12 = scmp.eq.s32.totalorder %s2152_s18, 0 }
  0x57   : > { %p1774_p6 = scmp.lt.s32.totalorder %s2152_s18, 4  ;;  %p2868_p3 = scmp.eq.s32.totalorder %s2211_s19, 3 }
  0x58   : > { %s2339_s12 = scalar_select %p27_p4, %s2148_s17, %s29_s25  }
  0x59   : > { %p38_p0 = por %p37_p12, %p36_p8  ;;  %p2343_p5 = por %p2868_p3, %p36_p8 }
  0x5a   : > { %s194_s24 = sand.u32 1, %s2148_s17   ;;  %s1686_s27 = sshll.u32 %s2152_s18, 12 }
  0x5b   : > { %s1557_s30 = sshll.u32 %s194_s24, 8  ;;  %s2352_s29 = scalar_lea.hbm %s2842_s0, %s1686_s27 }
  0x5c   : > { %s198_s5 = scalar_lea.vmem [#allocation2], %s1557_s30  ;;  %p2354_p10 = pnand %p1774_p6, %p38_p0 }
  0x5d   : > { %s206_s6 = sshll.u32 %s198_s5, 4  ;;  %s2360_s8 = scalar_lea.sflag [#allocation3], %s194_s24  ;;  %s2358_s6 = int_to_ptr.vmem [resolvable:$true] %s206_s6 }
  0x5e   : > { %s2048_s9 = scalar_lea.hbm %s2352_s29, 4096  ;;  %p2050_p9 = pneg %p2354_p10 }
  0x5f   : > { %p2049_p7 = scmp.ne.s32.totalorder %s2352_s29, %s2048_s9  ;;  %s2053_s26 = scalar_lea.hbm %s2842_s0, 16384 }
  0x60   : > { %p2054_p1 = scmp.lt.u32.totalorder %s2352_s29, %s2842_s0  ;;  %p2055_p2 = scmp.lt.u32.totalorder %s2053_s26, %s2048_s9 }
  0x61   : > { %p2051_p11 = pnand %p2050_p9, %p2049_p7  ;;  %p2057_p8 = scmp.lt.u32.totalorder %s2048_s9, %s2352_s29 }
  0x62   : > { %p2056_p4 = por %p2055_p2, %p2054_p1 }
  0x63   : > { %p2052_p13 = pneg %p2051_p11 }
  0x64   : > { %p2058_p12 = por %p2057_p8, %p2056_p4 }
  0x66   : > { %p2059_p6 = pnand %p2058_p12, %p2052_p13 }
  0x68   : > { %2062 = shalt.err (!%p2059_p6)
}
  0x69   : > { %s2063_s24 = scalar_lea.vmem %s2358_s6, 4096  ;;  %s2159_s30 = smov [#allocation2]  }
  0x6a   : > { %p2064_p0 = scmp.ne.s32.totalorder %s2358_s6, %s2063_s24  ;;  %s2068_s14 = sshll.u32 %s2159_s30, 4  ;;  %s2069_s14 = int_to_ptr.vmem [resolvable:$false] %s2068_s14 }
  0x6b   : > { %s2070_s20 = scalar_lea.vmem %s2069_s14, 8192  ;;  %p2071_p11 = scmp.lt.s32.totalorder %s2358_s6, %s2069_s14 }
  0x6c   : > { %p2066_p3 = pnand %p2064_p0, %p2050_p9  ;;  %p2072_p1 = scmp.lt.s32.totalorder %s2070_s20, %s2063_s24 }
  0x6e   : > { %p2067_p7 = pneg %p2066_p3  ;;  %p2073_p2 = por %p2072_p1, %p2071_p11 }
  0x70   : > { %p2074_p4 = pnand %p2073_p2, %p2067_p7 }
  0x72   : > { %2077 = shalt.err (!%p2074_p4)
}
  0x73   : > { %s2160_s5 = smov 256   ;;  %s2161_s9 = smov 16  }
  0x74   : > { %1766 = dma.hbm_to_vmem [thread:$0]  (!%p2354_p10), %s2352_s29, 4096, %s2358_s6, %s2360_s8, %s2160_s5, %s2160_s5, %s2161_s9  }
  0x75   : > { %p2871_p9 = scmp.ne.s32.totalorder %s2865_s23, 0 }
  0x76   : > { %s2391_s28 = sand.u32 (!%p2871_p9), 1, %s2144_s16   ;;  %p2872_p13 = scmp.ne.s32.totalorder (!%p2871_p9), %s2863_s21, 0 }
  0x77   : > { %218 = sbr.rel (%p2871_p9) target bundleno = 927 (0x39f), region = 36  ;;  %s1562_s11 = sshll.u32 (!%p2871_p9), %s2391_s28, 8 }
  0x78   : > { %s221_s26 = scalar_lea.sflag (!%p2871_p9), [#allocation3], %s2391_s28  ;;  %s2395_s25 = scalar_lea.vmem (!%p2871_p9), [#allocation2], %s1562_s11 }
  0x7e   : > { %2123 = dma.done.wait (%p2872_p13), %s221_s26, 4096  }
  0x7f   : > { %2125 = vsyncadd (%p2872_p13), %s221_s26, 4294963200  ;;  %p2873_p10 = scmp.eq.s32.totalorder %s2211_s19, 0 }
  0x81   : > { %2127 = dma.done.wait (%p2873_p10), [#allocation6], 8192   ;;  %p2874_p8 = pmov %p2873_p10 }
  0x83   : > { %2129 = vsyncadd (%p2874_p8), [#allocation6], 4294959104  ;;  %p2875_p12 = pmov %p2874_p8 }
  0x84   : > { %p2876_p6 = pmov %p2874_p8 }
  0x85   : > { %2131 = dma.done.wait (%p2875_p12), [#allocation9], 4096  }
  0x86   : > { %2133 = vsyncadd (%p2876_p6), [#allocation9], 4294963200  ;;  %v1820_v0 = vld [vmem:[#allocation5 + $0x4] ss:$8 sps:$4 sm:$0xff]   ;;  %v1822_v1 = vld [vmem:[#allocation5] ss:$8 sps:$4 sm:$0xff]  }
  0x87   : > { %503 = vmatprep.subr.bf16.mxu0 %v1820_v0  ;;  %v1823_v2 = vld [vmem:[#allocation5 + $0x14] ss:$8 sps:$4 sm:$0xff]   ;;  %v1825_v3 = vld [vmem:[#allocation5 + $0x10] ss:$8 sps:$4 sm:$0xff]   ;;  %v1826_v4 = vld [vmem:[#allocation5 + $0x24] ss:$8 sps:$4 sm:$0xff]  }
  0x88   : > { %504 = vmatpush1.bf16.msra.mxu0 %v1822_v1  ;;  %v1828_v5 = vld [vmem:[#allocation5 + $0x20] ss:$8 sps:$4 sm:$0xff]   ;;  %v1829_v6 = vld [vmem:[#allocation5 + $0x34] ss:$8 sps:$4 sm:$0xff]   ;;  %v1831_v7 = vld [vmem:[#allocation5 + $0x30] ss:$8 sps:$4 sm:$0xff]  }
  0x89   : > { %505 = vmatprep.subr.bf16.mxu0 %v1823_v2  ;;  %v1832_v8 = vld [vmem:[#allocation5 + $0x44] ss:$8 sps:$4 sm:$0xff]   ;;  %v1834_v9 = vld [vmem:[#allocation5 + $0x40] ss:$8 sps:$4 sm:$0xff]   ;;  %v1835_v10 = vld [vmem:[#allocation5 + $0x54] ss:$8 sps:$4 sm:$0xff]  }
  0x8a   : > { %v1837_v11 = vld [vmem:[#allocation5 + $0x50] ss:$8 sps:$4 sm:$0xff]   ;;  %v1838_v12 = vld [vmem:[#allocation5 + $0x64] ss:$8 sps:$4 sm:$0xff]   ;;  %v1840_v16 = vld [vmem:[#allocation5 + $0x60] ss:$8 sps:$4 sm:$0xff]  }
  0x8b   : > { %v264_v13 = vld [vmem:[%s2395_s25 + $0x8] sm:$0xff]  ;;  %v266_v14 = vld [vmem:[%s2395_s25 + $0x18] sm:$0xff]  ;;  %v263_v50 = vld [vmem:[%s2395_s25] sm:$0xff]  ;;  %s1566_s21 = sshll.u32 %s2391_s28, 7  ;;  %s1704_s29 = sshll.u32 %s2211_s19, 11 }
  0x8c   : > { %506 = vmatpush1.bf16.msra.mxu0 %v1825_v3  ;;  %v296_v15 = vpack.c.bf16 %v266_v14, %v264_v13  ;;  %v1841_v17 = vld [vmem:[#allocation5 + $0x74] ss:$8 sps:$4 sm:$0xff]   ;;  %v1843_v18 = vld [vmem:[#allocation5 + $0x70] ss:$8 sps:$4 sm:$0xff]   ;;  %v1844_v19 = vld [vmem:[#allocation5 + $0x84] ss:$8 sps:$4 sm:$0xff]   ;;  %s2795_s27 = scalar_lea.hbm %s2846_s4, %s1704_s29 }
  0x8d   : > { %507 = vmatprep.subr.bf16.mxu0 %v1826_v4  ;;  %v1846_v20 = vld [vmem:[#allocation5 + $0x80] ss:$8 sps:$4 sm:$0xff]   ;;  %v1847_v21 = vld [vmem:[#allocation5 + $0x94] ss:$8 sps:$4 sm:$0xff]   ;;  %v1868_v22 = vld [vmem:[#allocation7 + $0x4] ss:$8 sps:$4 sm:$0xff]  }
  0x8e   : > { %535 = vmatprep.mubr.bf16.mxu0 %v296_v15  ;;  %v1870_v23 = vld [vmem:[#allocation7] ss:$8 sps:$4 sm:$0xff]   ;;  %v1849_v24 = vld [vmem:[#allocation5 + $0x90] ss:$8 sps:$4 sm:$0xff]   ;;  %856 = vmatprep.subr.bf16.mxu1 %v1868_v22  ;;  %v1871_v25 = vld [vmem:[#allocation7 + $0x14] ss:$8 sps:$4 sm:$0xff]  }
  0x8f   : > { %v1850_v26 = vld [vmem:[#allocation5 + $0xa4] ss:$8 sps:$4 sm:$0xff]   ;;  %857 = vmatpush1.bf16.msra.mxu1 %v1870_v23  ;;  %v1873_v27 = vld [vmem:[#allocation7 + $0x10] ss:$8 sps:$4 sm:$0xff]   ;;  %v1852_v29 = vld [vmem:[#allocation5 + $0xa0] ss:$8 sps:$4 sm:$0xff]  }
  0x90   : > { %508 = vmatpush1.bf16.msra.mxu0 %v1828_v5  ;;  %858 = vmatprep.subr.bf16.mxu1 %v1871_v25  ;;  %v1874_v28 = vld [vmem:[#allocation7 + $0x24] ss:$8 sps:$4 sm:$0xff]   ;;  %v1853_v30 = vld [vmem:[#allocation5 + $0xb4] ss:$8 sps:$4 sm:$0xff]   ;;  %v1876_v31 = vld [vmem:[#allocation7 + $0x20] ss:$8 sps:$4 sm:$0xff]  }
  0x91   : > { %509 = vmatprep.subr.bf16.mxu0 %v1829_v6  ;;  %v1877_v32 = vld [vmem:[#allocation7 + $0x34] ss:$8 sps:$4 sm:$0xff]   ;;  %v1855_v33 = vld [vmem:[#allocation5 + $0xb0] ss:$8 sps:$4 sm:$0xff]   ;;  %v1856_v34 = vld [vmem:[#allocation5 + $0xc4] ss:$8 sps:$4 sm:$0xff]  }
  0x92   : > { %v1879_v35 = vld [vmem:[#allocation7 + $0x30] ss:$8 sps:$4 sm:$0xff]   ;;  %v1880_v36 = vld [vmem:[#allocation7 + $0x44] ss:$8 sps:$4 sm:$0xff]   ;;  %v1858_v37 = vld [vmem:[#allocation5 + $0xc0] ss:$8 sps:$4 sm:$0xff]  }
  0x93   : > { %859 = vmatpush1.bf16.msra.mxu1 %v1873_v27  ;;  %v1859_v38 = vld [vmem:[#allocation5 + $0xd4] ss:$8 sps:$4 sm:$0xff]   ;;  %v1882_v39 = vld [vmem:[#allocation7 + $0x40] ss:$8 sps:$4 sm:$0xff]   ;;  %v1861_v41 = vld [vmem:[#allocation5 + $0xd0] ss:$8 sps:$4 sm:$0xff]  }
  0x94   : > { %510 = vmatpush1.bf16.msra.mxu0 %v1831_v7  ;;  %860 = vmatprep.subr.bf16.mxu1 %v1874_v28  ;;  %v1883_v40 = vld [vmem:[#allocation7 + $0x54] ss:$8 sps:$4 sm:$0xff]   ;;  %v1862_v42 = vld [vmem:[#allocation5 + $0xe4] ss:$8 sps:$4 sm:$0xff]   ;;  %v1885_v43 = vld [vmem:[#allocation7 + $0x50] ss:$8 sps:$4 sm:$0xff]  }
  0x95   : > { %511 = vmatprep.subr.bf16.mxu0 %v1832_v8  ;;  %v1886_v44 = vld [vmem:[#allocation7 + $0x64] ss:$8 sps:$4 sm:$0xff]   ;;  %v1864_v45 = vld [vmem:[#allocation5 + $0xe0] ss:$8 sps:$4 sm:$0xff]   ;;  %v1865_v47 = vld [vmem:[#allocation5 + $0xf4] ss:$8 sps:$4 sm:$0xff]  }
  0x96   : > { %v1888_v46 = vld [vmem:[#allocation7 + $0x60] ss:$8 sps:$4 sm:$0xff]   ;;  %v1889_v48 = vld [vmem:[#allocation7 + $0x74] ss:$8 sps:$4 sm:$0xff]   ;;  %v1867_v49 = vld [vmem:[#allocation5 + $0xf0] ss:$8 sps:$4 sm:$0xff]  }
  0x97   : > { %861 = vmatpush1.bf16.msra.mxu1 %v1876_v31  ;;  %v265_v51 = vld [vmem:[%s2395_s25 + $0x10] sm:$0xff]  ;;  %v268_v53 = vld [vmem:[%s2395_s25 + $0x28] sm:$0xff]  ;;  %v270_v54 = vld [vmem:[%s2395_s25 + $0x38] sm:$0xff]  ;;  %s2774_s23 = scalar_lea.vmem [#allocation10], %s1566_s21  ;;  %s1435_s24 = scalar_lea.sflag [#allocation4], %s2391_s28 }
  0x98   : > { %512 = vmatpush1.bf16.msra.mxu0 %v1834_v9  ;;  %862 = vmatprep.subr.bf16.mxu1 %v1877_v32  ;;  %v1891_v52 = vld [vmem:[#allocation7 + $0x70] ss:$8 sps:$4 sm:$0xff]   ;;  %v1892_v55 = vld [vmem:[#allocation7 + $0x84] ss:$8 sps:$4 sm:$0xff]   ;;  %v295_v56 = vpack.c.bf16 %v265_v51, %v263_v50  ;;  %v298_v57 = vpack.c.bf16 %v270_v54, %v268_v53  ;;  %v1894_v58 = vld [vmem:[#allocation7 + $0x80] ss:$8 sps:$4 sm:$0xff]  }
  0x99   : > { %513 = vmatprep.subr.bf16.mxu0 %v1835_v10  ;;  %v1895_v59 = vld [vmem:[#allocation7 + $0x94] ss:$8 sps:$4 sm:$0xff]   ;;  %v267_v60 = vld [vmem:[%s2395_s25 + $0x20] sm:$0xff]  ;;  %v1897_v62 = vld [vmem:[#allocation7 + $0x90] ss:$8 sps:$4 sm:$0xff]   ;;  %s1449_s6 = sshll.u32 %s2774_s23, 4  ;;  %s2797_s6 = int_to_ptr.vmem [resolvable:$true] %s1449_s6 }
  0x9a   : > { %v269_v61 = vld [vmem:[%s2395_s25 + $0x30] sm:$0xff]  ;;  %v272_v63 = vld [vmem:[%s2395_s25 + $0x48] sm:$0xff]  ;;  %v274_v0 = vld [vmem:[%s2395_s25 + $0x58] sm:$0xff]  ;;  %s2078_s19 = scalar_lea.vmem %s2797_s6, 2048  ;;  %s2162_s30 = smov [#allocation10]  }
  0x9b   : > { %863 = vmatpush1.bf16.msra.mxu1 %v1879_v35  ;;  %v1898_v1 = vld [vmem:[#allocation7 + $0xa4] ss:$8 sps:$4 sm:$0xff]   ;;  %v297_v2 = vpack.c.bf16 %v269_v61, %v267_v60  ;;  %v300_v3 = vpack.c.bf16 %v274_v0, %v272_v63  ;;  %v1900_v4 = vld [vmem:[#allocation7 + $0xa0] ss:$8 sps:$4 sm:$0xff]   ;;  %v1901_v5 = vld [vmem:[#allocation7 + $0xb4] ss:$8 sps:$4 sm:$0xff]   ;;  %p2079_p0 = scmp.ne.s32.totalorder %s2797_s6, %s2078_s19 }
  0x9c   : > { %514 = vmatpush1.bf16.msra.mxu0 %v1837_v11  ;;  %864 = vmatprep.subr.bf16.mxu1 %v1880_v36  ;;  %v271_v6 = vld [vmem:[%s2395_s25 + $0x40] sm:$0xff]  ;;  %v273_v7 = vld [vmem:[%s2395_s25 + $0x50] sm:$0xff]  ;;  %v276_v9 = vld [vmem:[%s2395_s25 + $0x68] sm:$0xff]  ;;  %s2082_s14 = sshll.u32 %s2162_s30, 4  ;;  %s2083_s14 = int_to_ptr.vmem [resolvable:$false] %s2082_s14 }
  0x9d   : > { %515 = vmatprep.subr.bf16.mxu0 %v1838_v12  ;;  %v1903_v8 = vld [vmem:[#allocation7 + $0xb0] ss:$8 sps:$4 sm:$0xff]   ;;  %v1904_v11 = vld [vmem:[#allocation7 + $0xc4] ss:$8 sps:$4 sm:$0xff]   ;;  %v299_v12 = vpack.c.bf16 %v273_v7, %v271_v6  ;;  %v1906_v14 = vld [vmem:[#allocation7 + $0xc0] ss:$8 sps:$4 sm:$0xff]   ;;  %p2080_p3 = pnand %p2079_p0, %p2343_p5  ;;  %p2085_p11 = scmp.lt.s32.totalorder %s2797_s6, %s2083_s14 }
  0x9e   : > { %v278_v10 = vld [vmem:[%s2395_s25 + $0x78] sm:$0xff]  ;;  %v279_v23 = vld [vmem:[%s2395_s25 + $0x80] sm:$0xff]  ;;  %v284_v25 = vld [vmem:[%s2395_s25 + $0xa8] sm:$0xff]  ;;  %s2084_s20 = scalar_lea.vmem %s2083_s14, 4096 }
  0x9f   : > { %865 = vmatpush1.bf16.msra.mxu1 %v1882_v39  ;;  %v302_v13 = vpack.c.bf16 %v278_v10, %v276_v9  ;;  %v1907_v15 = vld [vmem:[#allocation7 + $0xd4] ss:$8 sps:$4 sm:$0xff]   ;;  %v288_v31 = vld [vmem:[%s2395_s25 + $0xc8] sm:$0xff]  ;;  %v287_v35 = vld [vmem:[%s2395_s25 + $0xc0] sm:$0xff]  ;;  %p2081_p7 = pneg %p2080_p3  ;;  %p2086_p1 = scmp.lt.s32.totalorder %s2084_s20, %s2078_s19 }
  0xa0   : > { %516 = vmatpush1.bf16.msra.mxu0 %v1840_v16  ;;  %866 = vmatprep.subr.bf16.mxu1 %v1883_v40  ;;  %v275_v16 = vld [vmem:[%s2395_s25 + $0x60] sm:$0xff]  ;;  %v290_v32 = vld [vmem:[%s2395_s25 + $0xd8] sm:$0xff]  ;;  %v289_v36 = vld [vmem:[%s2395_s25 + $0xd0] sm:$0xff] }
  0xa1   : > { %517 = vmatprep.subr.bf16.mxu0 %v1841_v17  ;;  %v277_v17 = vld [vmem:[%s2395_s25 + $0x70] sm:$0xff]  ;;  %v307_v39 = vpack.c.bf16 %v289_v36, %v287_v35  ;;  %v2452_v53 = vld [vmem:[#allocation8 + $0x20] ss:$8 sps:$4 sm:$0xff]   ;;  %v2473_v60 = vld [vmem:[#allocation8 + $0x64] ss:$8 sps:$4 sm:$0xff]   ;;  %p2087_p2 = por %p2086_p1, %p2085_p11 }
  0xa2   : > { %v2443_v50 = vld [vmem:[#allocation8 + $0x14] ss:$8 sps:$4 sm:$0xff]   ;;  %v2446_v51 = vld [vmem:[#allocation8 + $0x10] ss:$8 sps:$4 sm:$0xff]   ;;  %v2476_v61 = vld [vmem:[#allocation8 + $0x60] ss:$8 sps:$4 sm:$0xff]  }
  0xa3   : > { %867 = vmatpush1.bf16.msra.mxu1 %v1885_v43  ;;  %v2455_v54 = vld [vmem:[#allocation8 + $0x34] ss:$8 sps:$4 sm:$0xff]   ;;  %v2482_v63 = vld [vmem:[#allocation8 + $0x70] ss:$8 sps:$4 sm:$0xff]   ;;  %v2485_v0 = vld [vmem:[#allocation8 + $0x84] ss:$8 sps:$4 sm:$0xff]   ;;  %p2088_p4 = pnand %p2087_p2, %p2081_p7 }
  0xa4   : > { %518 = vmatpush1.bf16.msra.mxu0 %v1843_v18  ;;  %868 = vmatprep.subr.bf16.mxu1 %v1886_v44  ;;  %v1909_v18 = vld [vmem:[#allocation7 + $0xd0] ss:$8 sps:$4 sm:$0xff]   ;;  %v1910_v44 = vld [vmem:[#allocation7 + $0xe4] ss:$8 sps:$4 sm:$0xff]   ;;  %v2503_v6 = vld [vmem:[#allocation8 + $0xb4] ss:$8 sps:$4 sm:$0xff]  }
  0xa5   : > { %519 = vmatprep.subr.bf16.mxu0 %v1844_v19  ;;  %v280_v19 = vld [vmem:[%s2395_s25 + $0x88] sm:$0xff]  ;;  %v2506_v7 = vld [vmem:[#allocation8 + $0xb0] ss:$8 sps:$4 sm:$0xff]   ;;  %v2515_v10 = vld [vmem:[#allocation8 + $0xd4] ss:$8 sps:$4 sm:$0xff]  }
  0xa6   : > { %v2512_v9 = vld [vmem:[#allocation8 + $0xc0] ss:$8 sps:$4 sm:$0xff]  }
  0xa7   : > { %869 = vmatpush1.bf16.msra.mxu1 %v1888_v46  ;;  %v1913_v46 = vld [vmem:[#allocation7 + $0xf4] ss:$8 sps:$4 sm:$0xff]  }
  0xa8   : > { %520 = vmatpush1.bf16.msra.mxu0 %v1846_v20  ;;  %870 = vmatprep.subr.bf16.mxu1 %v1889_v48  ;;  %v282_v20 = vld [vmem:[%s2395_s25 + $0x98] sm:$0xff]  ;;  %v2441_v48 = vld [vmem:[#allocation8] ss:$8 sps:$4 sm:$0xff]  }
  0xa9   : > { %521 = vmatprep.subr.bf16.mxu0 %v1847_v21  ;;  %v301_v21 = vpack.c.bf16 %v277_v17, %v275_v16  ;;  %v304_v22 = vpack.c.bf16 %v282_v20, %v280_v19 }
  0xab   : > { %871 = vmatpush1.bf16.msra.mxu1 %v1891_v52  ;;  %v2449_v52 = vld [vmem:[#allocation8 + $0x24] ss:$8 sps:$4 sm:$0xff]  }
  0xac   : > { %522 = vmatpush1.bf16.msra.mxu0 %v1849_v24  ;;  %872 = vmatprep.subr.bf16.mxu1 %v1892_v55  ;;  %v281_v24 = vld [vmem:[%s2395_s25 + $0x90] sm:$0xff] }
  0xad   : > { %523 = vmatprep.subr.bf16.mxu0 %v1850_v26  ;;  %v286_v26 = vld [vmem:[%s2395_s25 + $0xb8] sm:$0xff]  ;;  %v303_v27 = vpack.c.bf16 %v281_v24, %v279_v23 }
  0xae   : > { %v306_v28 = vpack.c.bf16 %v286_v26, %v284_v25  ;;  %v2458_v55 = vld [vmem:[#allocation8 + $0x30] ss:$8 sps:$4 sm:$0xff]  }
  0xaf   : > { %873 = vmatpush1.bf16.msra.mxu1 %v1894_v58  ;;  %v2467_v58 = vld [vmem:[#allocation8 + $0x54] ss:$8 sps:$4 sm:$0xff]  }
  0xb0   : > { %524 = vmatpush1.bf16.msra.mxu0 %v1852_v29  ;;  %874 = vmatprep.subr.bf16.mxu1 %v1895_v59  ;;  %v283_v29 = vld [vmem:[%s2395_s25 + $0xa0] sm:$0xff]  ;;  %v2470_v59 = vld [vmem:[#allocation8 + $0x50] ss:$8 sps:$4 sm:$0xff]  }
  0xb1   : > { %525 = vmatprep.subr.bf16.mxu0 %v1853_v30  ;;  %v285_v30 = vld [vmem:[%s2395_s25 + $0xb0] sm:$0xff] }
  0xb3   : > { %875 = vmatpush1.bf16.msra.mxu1 %v1897_v62  ;;  %v2479_v62 = vld [vmem:[#allocation8 + $0x74] ss:$8 sps:$4 sm:$0xff]  }
  0xb4   : > { %526 = vmatpush1.bf16.msra.mxu0 %v1855_v33  ;;  %876 = vmatprep.subr.bf16.mxu1 %v1898_v1  ;;  %v305_v33 = vpack.c.bf16 %v285_v30, %v283_v29  ;;  %v2488_v1 = vld [vmem:[#allocation8 + $0x80] ss:$8 sps:$4 sm:$0xff]  }
  0xb5   : > { %527 = vmatprep.subr.bf16.mxu0 %v1856_v34  ;;  %v308_v34 = vpack.c.bf16 %v290_v32, %v288_v31 }
  0xb7   : > { %877 = vmatpush1.bf16.msra.mxu1 %v1900_v4  ;;  %v2497_v4 = vld [vmem:[#allocation8 + $0xa4] ss:$8 sps:$4 sm:$0xff]  }
  0xb8   : > { %528 = vmatpush1.bf16.msra.mxu0 %v1858_v37  ;;  %878 = vmatprep.subr.bf16.mxu1 %v1901_v5  ;;  %v292_v37 = vld [vmem:[%s2395_s25 + $0xe8] sm:$0xff] }
  0xb9   : > { %529 = vmatprep.subr.bf16.mxu0 %v1859_v38  ;;  %v294_v38 = vld [vmem:[%s2395_s25 + $0xf8] sm:$0xff]  ;;  %v2500_v5 = vld [vmem:[#allocation8 + $0xa0] ss:$8 sps:$4 sm:$0xff]  }
  0xba   : > { %v310_v40 = vpack.c.bf16 %v294_v38, %v292_v37 }
  0xbb   : > { %879 = vmatpush1.bf16.msra.mxu1 %v1903_v8  ;;  %v2509_v8 = vld [vmem:[#allocation8 + $0xc4] ss:$8 sps:$4 sm:$0xff]  }
  0xbc   : > { %530 = vmatpush1.bf16.msra.mxu0 %v1861_v41  ;;  %880 = vmatprep.subr.bf16.mxu1 %v1904_v11  ;;  %v291_v41 = vld [vmem:[%s2395_s25 + $0xe0] sm:$0xff]  ;;  %v2518_v11 = vld [vmem:[#allocation8 + $0xd0] ss:$8 sps:$4 sm:$0xff]  }
  0xbd   : > { %531 = vmatprep.subr.bf16.mxu0 %v1862_v42  ;;  %v293_v42 = vld [vmem:[%s2395_s25 + $0xf0] sm:$0xff] }
  0xbe   : > { %v309_v43 = vpack.c.bf16 %v293_v42, %v291_v41 }
  0xbf   : > { %881 = vmatpush1.bf16.msra.mxu1 %v1906_v14 }
  0xc0   : > { %532 = vmatpush1.bf16.msra.mxu0 %v1864_v45  ;;  %882 = vmatprep.subr.bf16.mxu1 %v1907_v15  ;;  %v1912_v45 = vld [vmem:[#allocation7 + $0xe0] ss:$8 sps:$4 sm:$0xff]  }
  0xc1   : > { %533 = vmatprep.subr.bf16.mxu0 %v1865_v47  ;;  %v1915_v47 = vld [vmem:[#allocation7 + $0xf0] ss:$8 sps:$4 sm:$0xff]  }
  0xc3   : > { %883 = vmatpush1.bf16.msra.mxu1 %v1909_v18 }
  0xc4   : > { %534 = vmatpush1.bf16.msra.mxu0 %v1867_v49  ;;  %884 = vmatprep.subr.bf16.mxu1 %v1910_v44  ;;  %v1918_v49 = vld [vmem:[#allocation8 + $0x4] ss:$8 sps:$4 sm:$0xff]  }
  0xc5   : > { %1209 = vmatprep.subr.bf16.mxu0 %v1918_v49 }
  0xc7   : > { %536 = vmatmul.mubr.bf16.vlgmr.msra.gmra.mrb[0].mxu0 %v295_v56  ;;  %885 = vmatpush1.bf16.msra.mxu1 %v1912_v45  ;;  %v2461_v56 = vld [vmem:[#allocation8 + $0x44] ss:$8 sps:$4 sm:$0xff]  }
  0xc8   : > { %545 = vmatprep.mubr.bf16.mxu0 %v298_v57  ;;  %886 = vmatprep.subr.bf16.mxu1 %v1913_v46  ;;  %v2464_v57 = vld [vmem:[#allocation8 + $0x40] ss:$8 sps:$4 sm:$0xff]  }
  0xc9   : > { %1210 = vmatpush1.bf16.msra.mxu0 %v2441_v48 }
  0xca   : > { %1211 = vmatprep.subr.bf16.mxu0 %v2443_v50 }
  0xcb   : > { %887 = vmatpush1.bf16.msra.mxu1 %v1915_v47 }
  0xcc   : > { %1705 = vmatprep.subr.bf16.mxu1 %v1918_v49 }
  0xcd   : > { %1212 = vmatpush1.bf16.msra.mxu0 %v2446_v51 }
  0xce   : > { %1213 = vmatprep.subr.bf16.mxu0 %v2449_v52 }
  0xcf   : > { %546 = vmatmul.mubr.bf16.gmra.mrb[4].mxu0 %v297_v2  ;;  %v2491_v2 = vld [vmem:[#allocation8 + $0x94] ss:$8 sps:$4 sm:$0xff]  }
  0xd0   : > { %555 = vmatprep.mubr.bf16.mxu0 %v300_v3  ;;  %v2494_v3 = vld [vmem:[#allocation8 + $0x90] ss:$8 sps:$4 sm:$0xff]  }
  0xd1   : > { %1214 = vmatpush1.bf16.msra.mxu0 %v2452_v53 }
  0xd2   : > { %1215 = vmatprep.subr.bf16.mxu0 %v2455_v54 }
  0xd5   : > { %1216 = vmatpush1.bf16.msra.mxu0 %v2458_v55 }
  0xd6   : > { %1217 = vmatprep.subr.bf16.mxu0 %v2461_v56 }
  0xd7   : > { %556 = vmatmul.mubr.bf16.gmra.mrb[8].mxu0 %v299_v12 }
  0xd8   : > { %565 = vmatprep.mubr.bf16.mxu0 %v302_v13 }
  0xd9   : > { %1218 = vmatpush1.bf16.msra.mxu0 %v2464_v57 }
  0xda   : > { %1219 = vmatprep.subr.bf16.mxu0 %v2467_v58 }
  0xdd   : > { %1220 = vmatpush1.bf16.msra.mxu0 %v2470_v59 }
  0xde   : > { %1221 = vmatprep.subr.bf16.mxu0 %v2473_v60 }
  0xdf   : > { %566 = vmatmul.mubr.bf16.gmra.mrb[12].mxu0 %v301_v21 }
  0xe0   : > { %575 = vmatprep.mubr.bf16.mxu0 %v304_v22 }
  0xe1   : > { %1222 = vmatpush1.bf16.msra.mxu0 %v2476_v61 }
  0xe2   : > { %1223 = vmatprep.subr.bf16.mxu0 %v2479_v62 }
  0xe5   : > { %1224 = vmatpush1.bf16.msra.mxu0 %v2482_v63 }
  0xe6   : > { %1225 = vmatprep.subr.bf16.mxu0 %v2485_v0 }
  0xe7   : > { %576 = vmatmul.mubr.bf16.gmra.mrb[16].mxu0 %v303_v27 }
  0xe8   : > { %585 = vmatprep.mubr.bf16.mxu0 %v306_v28 }
  0xe9   : > { %1226 = vmatpush1.bf16.msra.mxu0 %v2488_v1 }
  0xea   : > { %1227 = vmatprep.subr.bf16.mxu0 %v2491_v2 }
  0xed   : > { %1228 = vmatpush1.bf16.msra.mxu0 %v2494_v3 }
  0xee   : > { %1229 = vmatprep.subr.bf16.mxu0 %v2497_v4 }
  0xef   : > { %586 = vmatmul.mubr.bf16.gmra.mrb[20].mxu0 %v305_v33 }
  0xf0   : > { %595 = vmatprep.mubr.bf16.mxu0 %v308_v34 }
  0xf1   : > { %1230 = vmatpush1.bf16.msra.mxu0 %v2500_v5 }
  0xf2   : > { %1231 = vmatprep.subr.bf16.mxu0 %v2503_v6 }
  0xf5   : > { %1232 = vmatpush1.bf16.msra.mxu0 %v2506_v7 }
  0xf6   : > { %1233 = vmatprep.subr.bf16.mxu0 %v2509_v8 }
  0xf7   : > { %596 = vmatmul.mubr.bf16.gmra.mrb[24].mxu0 %v307_v39 }
  0xf8   : > { %605 = vmatprep.mubr.bf16.mxu0 %v310_v40 }
  0xf9   : > { %1234 = vmatpush1.bf16.msra.mxu0 %v2512_v9 }
  0xfa   : > { %1235 = vmatprep.subr.bf16.mxu0 %v2515_v10 }
  0xfd   : > { %1236 = vmatpush1.bf16.msra.mxu0 %v2518_v11 }
  0xff   : > { %606 = vmatmul.mubr.bf16.gmra.mrb[28].mxu0 %v309_v43 }
 0x19a   : > { %v2522_v12 = vpop.f32.mrb[0].mxu0 }
 0x19b   : > { %v2524_v13 = vpop.f32.mrb[1].mxu0  ;;  %v616_v19 = vmax.f32 %v2522_v12, 0.0 }
 0x19c   : > { %v2526_v14 = vpop.f32.mrb[2].mxu0  ;;  %v617_v17 = vmax.f32 %v2524_v13, 0.0 }
 0x19d   : > { %v618_v15 = vmax.f32 %v2526_v14, 0.0  ;;  %v2529_v16 = vpop.f32.mrb[3].mxu0 }
 0x19e   : > { %v619_v18 = vmax.f32 %v2529_v16, 0.0 }
 0x19f   : > { %v648_v21 = vpack.c.bf16 %v618_v15, %v616_v19 }
 0x1a0   : > { %v649_v20 = vpack.c.bf16 %v619_v18, %v617_v17 }
 0x1a2   : > { %v2542_v22 = vpop.f32.mrb[4].mxu0  ;;  %888 = vmatprep.mubr.bf16.mxu1 %v649_v20 }
 0x1a3   : > { %v2544_v23 = vpop.f32.mrb[5].mxu0  ;;  %889 = vmatmul.mubr.bf16.vlgmr.msra.gmra.mrb[0].mxu1 %v648_v21  ;;  %v620_v29 = vmax.f32 %v2542_v22, 0.0 }
 0x1a4   : > { %v2546_v24 = vpop.f32.mrb[6].mxu0  ;;  %1721 = vmatpush1.bf16.msra.mxu1 %v2441_v48  ;;  %v621_v27 = vmax.f32 %v2544_v23, 0.0 }
 0x1a5   : > { %v622_v25 = vmax.f32 %v2546_v24, 0.0  ;;  %v2550_v26 = vpop.f32.mrb[7].mxu0  ;;  %1706 = vmatprep.subr.bf16.mxu1 %v2443_v50 }
 0x1a6   : > { %v623_v28 = vmax.f32 %v2550_v26, 0.0 }
 0x1a7   : > { %v650_v31 = vpack.c.bf16 %v622_v25, %v620_v29 }
 0x1a8   : > { %v651_v30 = vpack.c.bf16 %v623_v28, %v621_v27  ;;  %1722 = vmatpush1.bf16.msra.mxu1 %v2446_v51 }
 0x1a9   : > { %1707 = vmatprep.subr.bf16.mxu1 %v2449_v52 }
 0x1aa   : > { %v2566_v32 = vpop.f32.mrb[8].mxu0  ;;  %898 = vmatprep.mubr.bf16.mxu1 %v651_v30 }
 0x1ab   : > { %v2568_v33 = vpop.f32.mrb[9].mxu0  ;;  %899 = vmatmul.mubr.bf16.gmra.mrb[4].mxu1 %v650_v31  ;;  %v624_v39 = vmax.f32 %v2566_v32, 0.0 }
 0x1ac   : > { %v2570_v34 = vpop.f32.mrb[10].mxu0  ;;  %1723 = vmatpush1.bf16.msra.mxu1 %v2452_v53  ;;  %v625_v37 = vmax.f32 %v2568_v33, 0.0 }
 0x1ad   : > { %v626_v35 = vmax.f32 %v2570_v34, 0.0  ;;  %v2574_v36 = vpop.f32.mrb[11].mxu0  ;;  %1708 = vmatprep.subr.bf16.mxu1 %v2455_v54 }
 0x1ae   : > { %v627_v38 = vmax.f32 %v2574_v36, 0.0 }
 0x1af   : > { %v652_v41 = vpack.c.bf16 %v626_v35, %v624_v39 }
 0x1b0   : > { %v653_v40 = vpack.c.bf16 %v627_v38, %v625_v37  ;;  %1724 = vmatpush1.bf16.msra.mxu1 %v2458_v55 }
 0x1b1   : > { %1709 = vmatprep.subr.bf16.mxu1 %v2461_v56 }
 0x1b2   : > { %v2590_v42 = vpop.f32.mrb[12].mxu0  ;;  %908 = vmatprep.mubr.bf16.mxu1 %v653_v40 }
 0x1b3   : > { %v2592_v43 = vpop.f32.mrb[13].mxu0  ;;  %909 = vmatmul.mubr.bf16.gmra.mrb[8].mxu1 %v652_v41  ;;  %v628_v49 = vmax.f32 %v2590_v42, 0.0 }
 0x1b4   : > { %v2594_v44 = vpop.f32.mrb[14].mxu0  ;;  %1725 = vmatpush1.bf16.msra.mxu1 %v2464_v57  ;;  %v629_v47 = vmax.f32 %v2592_v43, 0.0 }
 0x1b5   : > { %v630_v45 = vmax.f32 %v2594_v44, 0.0  ;;  %v2598_v46 = vpop.f32.mrb[15].mxu0  ;;  %1710 = vmatprep.subr.bf16.mxu1 %v2467_v58 }
 0x1b6   : > { %v631_v48 = vmax.f32 %v2598_v46, 0.0 }
 0x1b7   : > { %v654_v51 = vpack.c.bf16 %v630_v45, %v628_v49 }
 0x1b8   : > { %v655_v50 = vpack.c.bf16 %v631_v48, %v629_v47  ;;  %1726 = vmatpush1.bf16.msra.mxu1 %v2470_v59 }
 0x1b9   : > { %1711 = vmatprep.subr.bf16.mxu1 %v2473_v60 }
 0x1ba   : > { %v2614_v52 = vpop.f32.mrb[16].mxu0  ;;  %918 = vmatprep.mubr.bf16.mxu1 %v655_v50 }
 0x1bb   : > { %v2616_v53 = vpop.f32.mrb[17].mxu0  ;;  %919 = vmatmul.mubr.bf16.gmra.mrb[12].mxu1 %v654_v51  ;;  %v632_v59 = vmax.f32 %v2614_v52, 0.0 }
 0x1bc   : > { %v2618_v54 = vpop.f32.mrb[18].mxu0  ;;  %1727 = vmatpush1.bf16.msra.mxu1 %v2476_v61  ;;  %v633_v57 = vmax.f32 %v2616_v53, 0.0 }
 0x1bd   : > { %v634_v55 = vmax.f32 %v2618_v54, 0.0  ;;  %v2622_v56 = vpop.f32.mrb[19].mxu0  ;;  %1712 = vmatprep.subr.bf16.mxu1 %v2479_v62 }
 0x1be   : > { %v2862_v58 = vmax.f32 %v2622_v56, 0.0  ;;  %v2877_v46 = vmax.f32 %v2622_v56, 0.0 }
 0x1bf   : > { %v656_v61 = vpack.c.bf16 %v634_v55, %v632_v59 }
 0x1c0   : > { %v657_v60 = vpack.c.bf16 %v2862_v58, %v633_v57  ;;  %1728 = vmatpush1.bf16.msra.mxu1 %v2482_v63 }
 0x1c1   : > { %1713 = vmatprep.subr.bf16.mxu1 %v2485_v0 }
 0x1c2   : > { %v2638_v62 = vpop.f32.mrb[20].mxu0  ;;  %928 = vmatprep.mubr.bf16.mxu1 %v657_v60 }
 0x1c3   : > { %v2640_v20 = vpop.f32.mrb[21].mxu0  ;;  %929 = vmatmul.mubr.bf16.gmra.mrb[16].mxu1 %v656_v61  ;;  %v2861_v40 = vmax.f32 %v2638_v62, 0.0  ;;  %v2878_v52 = vmax.f32 %v2638_v62, 0.0 }
 0x1c4   : > { %v2642_v21 = vpop.f32.mrb[22].mxu0  ;;  %1729 = vmatpush1.bf16.msra.mxu1 %v2488_v1  ;;  %v2851_v31 = vmax.f32 %v2640_v20, 0.0  ;;  %v2880_v53 = vmax.f32 %v2640_v20, 0.0 }
 0x1c5   : > { %v2856_v30 = vmax.f32 %v2642_v21, 0.0  ;;  %v2646_v63 = vpop.f32.mrb[23].mxu0  ;;  %1714 = vmatprep.subr.bf16.mxu1 %v2491_v2  ;;  %v2879_v54 = vmax.f32 %v2642_v21, 0.0 }
 0x1c6   : > { %v2850_v0 = vmax.f32 %v2646_v63, 0.0  ;;  %v2881_v56 = vmax.f32 %v2646_v63, 0.0 }
 0x1c7   : > { %v658_v1 = vpack.c.bf16 %v2856_v30, %v2861_v40  ;;  %v1961_v30 = vld [vmem:[#allocation8 + $0xf0] ss:$8 sps:$4 sm:$0xff]  }
 0x1c8   : > { %v659_v41 = vpack.c.bf16 %v2850_v0, %v2851_v31  ;;  %1730 = vmatpush1.bf16.msra.mxu1 %v2494_v3 }
 0x1c9   : > { %1715 = vmatprep.subr.bf16.mxu1 %v2497_v4 }
 0x1ca   : > { %v2662_v2 = vpop.f32.mrb[24].mxu0  ;;  %938 = vmatprep.mubr.bf16.mxu1 %v659_v41 }
 0x1cb   : > { %v2664_v50 = vpop.f32.mrb[25].mxu0  ;;  %939 = vmatmul.mubr.bf16.gmra.mrb[20].mxu1 %v658_v1  ;;  %v2855_v0 = vmax.f32 %v2662_v2, 0.0  ;;  %v2882_v62 = vmax.f32 %v2662_v2, 0.0 }
 0x1cc   : > { %v2666_v51 = vpop.f32.mrb[26].mxu0  ;;  %1731 = vmatpush1.bf16.msra.mxu1 %v2500_v5  ;;  %v2853_v61 = vmax.f32 %v2664_v50, 0.0  ;;  %v2884_v20 = vmax.f32 %v2664_v50, 0.0 }
 0x1cd   : > { %v2854_v60 = vmax.f32 %v2666_v51, 0.0  ;;  %v2670_v3 = vpop.f32.mrb[27].mxu0  ;;  %1716 = vmatprep.subr.bf16.mxu1 %v2503_v6  ;;  %v2883_v21 = vmax.f32 %v2666_v51, 0.0 }
 0x1ce   : > { %v2852_v4 = vmax.f32 %v2670_v3, 0.0  ;;  %v2885_v63 = vmax.f32 %v2670_v3, 0.0 }
 0x1cf   : > { %v660_v5 = vpack.c.bf16 %v2854_v60, %v2855_v0  ;;  %v1963_v0 = vld [vmem:[#allocation8 + $0xf4] ss:$8 sps:$4 sm:$0xff]  }
 0x1d0   : > { %v661_v41 = vpack.c.bf16 %v2852_v4, %v2853_v61  ;;  %1732 = vmatpush1.bf16.msra.mxu1 %v2506_v7 }
 0x1d1   : > { %1717 = vmatprep.subr.bf16.mxu1 %v2509_v8 }
 0x1d2   : > { %v2686_v6 = vpop.f32.mrb[28].mxu0  ;;  %948 = vmatprep.mubr.bf16.mxu1 %v661_v41 }
 0x1d3   : > { %v2688_v1 = vpop.f32.mrb[29].mxu0  ;;  %949 = vmatmul.mubr.bf16.gmra.mrb[24].mxu1 %v660_v5  ;;  %v2860_v60 = vmax.f32 %v2686_v6, 0.0  ;;  %v1958_v5 = vld [vmem:[#allocation8 + $0xe0] ss:$8 sps:$4 sm:$0xff]   ;;  %v2886_v2 = vmax.f32 %v2686_v6, 0.0 }
 0x1d4   : > { %v2690_v31 = vpop.f32.mrb[30].mxu0  ;;  %1733 = vmatpush1.bf16.msra.mxu1 %v2512_v9  ;;  %v2858_v61 = vmax.f32 %v2688_v1, 0.0  ;;  %v2888_v50 = vmax.f32 %v2688_v1, 0.0 }
 0x1d5   : > { %v2859_v4 = vmax.f32 %v2690_v31, 0.0  ;;  %v2694_v7 = vpop.f32.mrb[31].mxu0  ;;  %1718 = vmatprep.subr.bf16.mxu1 %v2515_v10  ;;  %v1960_v10 = vld [vmem:[#allocation8 + $0xe4] ss:$8 sps:$4 sm:$0xff]   ;;  %v2887_v51 = vmax.f32 %v2690_v31, 0.0 }
 0x1d6   : > { %v2857_v8 = vmax.f32 %v2694_v7, 0.0  ;;  %1237 = vmatprep.subr.bf16.mxu0 %v1960_v10  ;;  %v2889_v3 = vmax.f32 %v2694_v7, 0.0 }
 0x1d7   : > { %v662_v9 = vpack.c.bf16 %v2859_v4, %v2860_v60  ;;  %1238 = vmatpush1.bf16.msra.mxu0 %v1958_v5 }
 0x1d8   : > { %v663_v41 = vpack.c.bf16 %v2857_v8, %v2858_v61  ;;  %1734 = vmatpush1.bf16.msra.mxu1 %v2518_v11  ;;  %1239 = vmatprep.subr.bf16.mxu0 %v1963_v0 }
 0x1d9   : > { %1719 = vmatprep.subr.bf16.mxu1 %v1960_v10 }
 0x1da   : > { %958 = vmatprep.mubr.bf16.mxu1 %v663_v41 }
 0x1db   : > { %959 = vmatmul.mubr.bf16.gmra.mrb[28].mxu1 %v662_v9  ;;  %1240 = vmatpush1.bf16.msra.mxu0 %v1961_v30 }
 0x1dc   : > { %1735 = vmatpush1.bf16.msra.mxu1 %v1958_v5 }
 0x1dd   : > { %1720 = vmatprep.subr.bf16.mxu1 %v1963_v0 }
 0x1e0   : > { %1736 = vmatpush1.bf16.msra.mxu1 %v1961_v30 }
 0x276   : > { %v890_v11 = vpop.f32.mrb[0].mxu1 }
 0x277   : > { %v892_v8 = vpop.f32.mrb[1].mxu1  ;;  %v969_v4 = vmul.f32 %v890_v11, %v616_v19 }
 0x278   : > { %v894_v61 = vpop.f32.mrb[2].mxu1  ;;  %v970_v10 = vmul.f32 %v892_v8, %v617_v17 }
 0x279   : > { %v971_v41 = vmul.f32 %v894_v61, %v618_v15  ;;  %v896_v9 = vpop.f32.mrb[3].mxu1 }
 0x27a   : > { %v972_v5 = vmul.f32 %v896_v9, %v619_v18 }
 0x27b   : > { %v1001_v60 = vpack.c.bf16 %v971_v41, %v969_v4 }
 0x27c   : > { %v1002_v0 = vpack.c.bf16 %v972_v5, %v970_v10 }
 0x27e   : > { %v900_v40 = vpop.f32.mrb[4].mxu1  ;;  %1241 = vmatprep.mubr.bf16.mxu0 %v1002_v0 }
 0x27f   : > { %v902_v30 = vpop.f32.mrb[5].mxu1  ;;  %1242 = vmatmul.mubr.bf16.vlgmr.msra.gmra.mrb[32].mxu0 %v1001_v60  ;;  %v973_v12 = vmul.f32 %v900_v40, %v620_v29 }
 0x280   : > { %v904_v58 = vpop.f32.mrb[6].mxu1  ;;  %v974_v13 = vmul.f32 %v902_v30, %v621_v27 }
 0x281   : > { %v975_v14 = vmul.f32 %v904_v58, %v622_v25  ;;  %v906_v15 = vpop.f32.mrb[7].mxu1 }
 0x282   : > { %v976_v16 = vmul.f32 %v906_v15, %v623_v28 }
 0x283   : > { %v1003_v17 = vpack.c.bf16 %v975_v14, %v973_v12 }
 0x284   : > { %v1004_v18 = vpack.c.bf16 %v976_v16, %v974_v13 }
 0x286   : > { %v910_v19 = vpop.f32.mrb[8].mxu1  ;;  %1251 = vmatprep.mubr.bf16.mxu0 %v1004_v18 }
 0x287   : > { %v912_v61 = vpop.f32.mrb[9].mxu1  ;;  %1252 = vmatmul.mubr.bf16.gmra.mrb[36].mxu0 %v1003_v17  ;;  %v977_v22 = vmul.f32 %v910_v19, %v624_v39 }
 0x288   : > { %v914_v60 = vpop.f32.mrb[10].mxu1  ;;  %v978_v23 = vmul.f32 %v912_v61, %v625_v37 }
 0x289   : > { %v979_v24 = vmul.f32 %v914_v60, %v626_v35  ;;  %v916_v25 = vpop.f32.mrb[11].mxu1 }
 0x28a   : > { %v980_v26 = vmul.f32 %v916_v25, %v627_v38 }
 0x28b   : > { %v1005_v27 = vpack.c.bf16 %v979_v24, %v977_v22 }
 0x28c   : > { %v1006_v28 = vpack.c.bf16 %v980_v26, %v978_v23 }
 0x28e   : > { %v920_v29 = vpop.f32.mrb[12].mxu1  ;;  %1261 = vmatprep.mubr.bf16.mxu0 %v1006_v28 }
 0x28f   : > { %v922_v58 = vpop.f32.mrb[13].mxu1  ;;  %1262 = vmatmul.mubr.bf16.gmra.mrb[40].mxu0 %v1005_v27  ;;  %v981_v32 = vmul.f32 %v920_v29, %v628_v49 }
 0x290   : > { %v924_v40 = vpop.f32.mrb[14].mxu1  ;;  %v982_v33 = vmul.f32 %v922_v58, %v629_v47 }
 0x291   : > { %v983_v34 = vmul.f32 %v924_v40, %v630_v45  ;;  %v926_v35 = vpop.f32.mrb[15].mxu1 }
 0x292   : > { %v984_v36 = vmul.f32 %v926_v35, %v631_v48 }
 0x293   : > { %v1007_v37 = vpack.c.bf16 %v983_v34, %v981_v32 }
 0x294   : > { %v1008_v38 = vpack.c.bf16 %v984_v36, %v982_v33 }
 0x296   : > { %v930_v39 = vpop.f32.mrb[16].mxu1  ;;  %1271 = vmatprep.mubr.bf16.mxu0 %v1008_v38 }
 0x297   : > { %v932_v4 = vpop.f32.mrb[17].mxu1  ;;  %1272 = vmatmul.mubr.bf16.gmra.mrb[44].mxu0 %v1007_v37  ;;  %v985_v42 = vmul.f32 %v930_v39, %v632_v59 }
 0x298   : > { %v934_v8 = vpop.f32.mrb[18].mxu1  ;;  %v986_v43 = vmul.f32 %v932_v4, %v633_v57 }
 0x299   : > { %v987_v44 = vmul.f32 %v934_v8, %v634_v55  ;;  %v936_v45 = vpop.f32.mrb[19].mxu1 }
 0x29a   : > { %v988_v47 = vmul.f32 %v936_v45, %v2877_v46 }
 0x29b   : > { %v1009_v48 = vpack.c.bf16 %v987_v44, %v985_v42 }
 0x29c   : > { %v1010_v49 = vpack.c.bf16 %v988_v47, %v986_v43 }
 0x29e   : > { %v940_v11 = vpop.f32.mrb[20].mxu1  ;;  %1281 = vmatprep.mubr.bf16.mxu1 %v1010_v49 }
 0x29f   : > { %v942_v41 = vpop.f32.mrb[21].mxu1  ;;  %1282 = vmatmul.mubr.bf16.vlgmr.msra.gmra.mrb[32].mxu1 %v1009_v48  ;;  %v989_v59 = vmul.f32 %v940_v11, %v2878_v52 }
 0x2a0   : > { %v944_v9 = vpop.f32.mrb[22].mxu1  ;;  %v990_v57 = vmul.f32 %v942_v41, %v2880_v53 }
 0x2a1   : > { %v991_v55 = vmul.f32 %v944_v9, %v2879_v54  ;;  %v946_v10 = vpop.f32.mrb[23].mxu1 }
 0x2a2   : > { %v992_v5 = vmul.f32 %v946_v10, %v2881_v56 }
 0x2a3   : > { %v1011_v0 = vpack.c.bf16 %v991_v55, %v989_v59 }
 0x2a4   : > { %v1012_v30 = vpack.c.bf16 %v992_v5, %v990_v57 }
 0x2a6   : > { %v950_v12 = vpop.f32.mrb[24].mxu1  ;;  %1291 = vmatprep.mubr.bf16.mxu1 %v1012_v30 }
 0x2a7   : > { %v952_v14 = vpop.f32.mrb[25].mxu1  ;;  %1292 = vmatmul.mubr.bf16.gmra.mrb[36].mxu1 %v1011_v0  ;;  %v993_v13 = vmul.f32 %v950_v12, %v2882_v62 }
 0x2a8   : > { %v954_v15 = vpop.f32.mrb[26].mxu1  ;;  %v994_v18 = vmul.f32 %v952_v14, %v2884_v20 }
 0x2a9   : > { %v995_v16 = vmul.f32 %v954_v15, %v2883_v21  ;;  %v956_v17 = vpop.f32.mrb[27].mxu1 }
 0x2aa   : > { %v996_v19 = vmul.f32 %v956_v17, %v2885_v63 }
 0x2ab   : > { %v1013_v61 = vpack.c.bf16 %v995_v16, %v993_v13 }
 0x2ac   : > { %v1014_v60 = vpack.c.bf16 %v996_v19, %v994_v18 }
 0x2ae   : > { %v960_v22 = vpop.f32.mrb[28].mxu1  ;;  %1301 = vmatprep.mubr.bf16.mxu1 %v1014_v60 }
 0x2af   : > { %v962_v24 = vpop.f32.mrb[29].mxu1  ;;  %1302 = vmatmul.mubr.bf16.gmra.mrb[40].mxu1 %v1013_v61  ;;  %v997_v23 = vmul.f32 %v960_v22, %v2886_v2 }
 0x2b0   : > { %v964_v25 = vpop.f32.mrb[30].mxu1  ;;  %v998_v28 = vmul.f32 %v962_v24, %v2888_v50 }
 0x2b1   : > { %v999_v26 = vmul.f32 %v964_v25, %v2887_v51  ;;  %v966_v27 = vpop.f32.mrb[31].mxu1 }
 0x2b2   : > { %v1000_v29 = vmul.f32 %v966_v27, %v2889_v3 }
 0x2b3   : > { %v1015_v58 = vpack.c.bf16 %v999_v26, %v997_v23 }
 0x2b4   : > { %v1016_v40 = vpack.c.bf16 %v1000_v29, %v998_v28 }
 0x2b6   : > { %1311 = vmatprep.mubr.bf16.mxu1 %v1016_v40 }
 0x2b7   : > { %1312 = vmatmul.mubr.bf16.gmra.mrb[44].mxu1 %v1015_v58 }
 0x352   : > { %v1243_v32 = vpop.f32.mrb[32].mxu0 }
 0x353   : > { %v1245_v34 = vpop.f32.mrb[33].mxu0 }
 0x354   : > { %v1687_v35 = vpack.c.bf16 %v1245_v34, %v1243_v32  ;;  %v1247_v6 = vpop.f32.mrb[34].mxu0 }
 0x355   : > { %v1249_v33 = vpop.f32.mrb[35].mxu0 }
 0x356   : > { %1418 = vst [vmem:[%s2774_s23] sm:$0xff] %v1687_v35  ;;  %v1688_v31 = vpack.c.bf16 %v1249_v33, %v1247_v6 }
 0x358   : > { %1419 = vst [vmem:[%s2774_s23 + $0x8] sm:$0xff] %v1688_v31 }
 0x35a   : > { %v1253_v1 = vpop.f32.mrb[36].mxu0 }
 0x35b   : > { %v1255_v7 = vpop.f32.mrb[37].mxu0 }
 0x35c   : > { %v1689_v36 = vpack.c.bf16 %v1255_v7, %v1253_v1  ;;  %v1257_v37 = vpop.f32.mrb[38].mxu0 }
 0x35d   : > { %v1259_v38 = vpop.f32.mrb[39].mxu0 }
 0x35e   : > { %1420 = vst [vmem:[%s2774_s23 + $0x10] sm:$0xff] %v1689_v36  ;;  %v1690_v39 = vpack.c.bf16 %v1259_v38, %v1257_v37 }
 0x360   : > { %1421 = vst [vmem:[%s2774_s23 + $0x18] sm:$0xff] %v1690_v39 }
 0x362   : > { %v1263_v4 = vpop.f32.mrb[40].mxu0 }
 0x363   : > { %v1265_v8 = vpop.f32.mrb[41].mxu0 }
 0x364   : > { %v1691_v42 = vpack.c.bf16 %v1265_v8, %v1263_v4  ;;  %v1267_v44 = vpop.f32.mrb[42].mxu0 }
 0x365   : > { %v1269_v45 = vpop.f32.mrb[43].mxu0 }
 0x366   : > { %1422 = vst [vmem:[%s2774_s23 + $0x20] sm:$0xff] %v1691_v42  ;;  %v1692_v43 = vpack.c.bf16 %v1269_v45, %v1267_v44 }
 0x368   : > { %1423 = vst [vmem:[%s2774_s23 + $0x28] sm:$0xff] %v1692_v43 }
 0x36a   : > { %v1273_v46 = vpop.f32.mrb[44].mxu0 }
 0x36b   : > { %v1275_v47 = vpop.f32.mrb[45].mxu0 }
 0x36c   : > { %v1693_v48 = vpack.c.bf16 %v1275_v47, %v1273_v46  ;;  %v1277_v49 = vpop.f32.mrb[46].mxu0 }
 0x36d   : > { %v1279_v11 = vpop.f32.mrb[47].mxu0 }
 0x36e   : > { %1424 = vst [vmem:[%s2774_s23 + $0x30] sm:$0xff] %v1693_v48  ;;  %v1694_v41 = vpack.c.bf16 %v1279_v11, %v1277_v49 }
 0x370   : > { %1425 = vst [vmem:[%s2774_s23 + $0x38] sm:$0xff] %v1694_v41 }
 0x372   : > { %v1283_v9 = vpop.f32.mrb[32].mxu1 }
 0x373   : > { %v1285_v52 = vpop.f32.mrb[33].mxu1 }
 0x374   : > { %v1695_v59 = vpack.c.bf16 %v1285_v52, %v1283_v9  ;;  %v1287_v54 = vpop.f32.mrb[34].mxu1 }
 0x375   : > { %v1289_v55 = vpop.f32.mrb[35].mxu1 }
 0x376   : > { %1426 = vst [vmem:[%s2774_s23 + $0x40] sm:$0xff] %v1695_v59  ;;  %v1696_v10 = vpack.c.bf16 %v1289_v55, %v1287_v54 }
 0x378   : > { %1427 = vst [vmem:[%s2774_s23 + $0x48] sm:$0xff] %v1696_v10 }
 0x37a   : > { %v1293_v53 = vpop.f32.mrb[36].mxu1 }
 0x37b   : > { %v1295_v57 = vpop.f32.mrb[37].mxu1 }
 0x37c   : > { %v1697_v56 = vpack.c.bf16 %v1295_v57, %v1293_v53  ;;  %v1297_v5 = vpop.f32.mrb[38].mxu1 }
 0x37d   : > { %v1299_v0 = vpop.f32.mrb[39].mxu1 }
 0x37e   : > { %1428 = vst [vmem:[%s2774_s23 + $0x50] sm:$0xff] %v1697_v56  ;;  %v1698_v30 = vpack.c.bf16 %v1299_v0, %v1297_v5 }
 0x380   : > { %1429 = vst [vmem:[%s2774_s23 + $0x58] sm:$0xff] %v1698_v30 }
 0x382   : > { %v1303_v12 = vpop.f32.mrb[40].mxu1 }
 0x383   : > { %v1305_v14 = vpop.f32.mrb[41].mxu1 }
 0x384   : > { %v1699_v15 = vpack.c.bf16 %v1305_v14, %v1303_v12  ;;  %v1307_v62 = vpop.f32.mrb[42].mxu1 }
 0x385   : > { %v1309_v13 = vpop.f32.mrb[43].mxu1 }
 0x386   : > { %1430 = vst [vmem:[%s2774_s23 + $0x60] sm:$0xff] %v1699_v15  ;;  %v1700_v21 = vpack.c.bf16 %v1309_v13, %v1307_v62 }
 0x388   : > { %1431 = vst [vmem:[%s2774_s23 + $0x68] sm:$0xff] %v1700_v21 }
 0x38a   : > { %v1313_v16 = vpop.f32.mrb[44].mxu1 }
 0x38b   : > { %v1315_v17 = vpop.f32.mrb[45].mxu1 }
 0x38c   : > { %v1701_v20 = vpack.c.bf16 %v1315_v17, %v1313_v16  ;;  %v1317_v18 = vpop.f32.mrb[46].mxu1 }
 0x38d   : > { %v1319_v63 = vpop.f32.mrb[47].mxu1 }
 0x38e   : > { %1432 = vst [vmem:[%s2774_s23 + $0x70] sm:$0xff] %v1701_v20  ;;  %v1702_v19 = vpack.c.bf16 %v1319_v63, %v1317_v18 }
 0x390   : > { %1433 = vst [vmem:[%s2774_s23 + $0x78] sm:$0xff] %v1702_v19 }
 0x391   : > { %2091 = shalt.err (!%p2088_p4)
}
 0x392   : > { %s2092_s5 = scalar_lea.hbm %s2795_s27, 2048  ;;  %s2096_s26 = scalar_lea.hbm %s2846_s4, 8192 }
 0x393   : > { %p2093_p9 = scmp.ne.s32.totalorder %s2795_s27, %s2092_s5  ;;  %p2097_p8 = scmp.lt.u32.totalorder %s2795_s27, %s2846_s4 }
 0x394   : > { %p2098_p12 = scmp.lt.u32.totalorder %s2096_s26, %s2092_s5  ;;  %p2100_p0 = scmp.lt.u32.totalorder %s2092_s5, %s2795_s27 }
 0x395   : > { %p2094_p13 = pnand %p2093_p9, %p2343_p5 }
 0x396   : > { %p2099_p6 = por %p2098_p12, %p2097_p8 }
 0x397   : > { %p2095_p10 = pneg %p2094_p13 }
 0x398   : > { %p2101_p3 = por %p2100_p0, %p2099_p6 }
 0x39a   : > { %p2102_p7 = pnand %p2101_p3, %p2095_p10 }
 0x39c   : > { %2105 = shalt.err (!%p2102_p7)
}
 0x39d   : > { %s2163_s23 = smov 128   ;;  %s2164_s29 = smov 8  }
 0x39e   : > { %1751 = dma.vmem_to_hbm [thread:$0]  (%p2343_p5), %s2797_s6, 2048, %s2795_s27, %s1435_s24, %s2163_s23, %s2163_s23, %s2164_s29  }
 0x39f PF: > { %p1778_p11 = scmp.ge.s32.totalorder %s2152_s18, 2  ;;  %s1464_s7 = sand.u32 1, %s2140_s15  }
 0x3a0   : > { %p2890_p1 = scmp.ne.s32.totalorder %s2864_s22, 0  ;;  %s1465_s8 = scalar_lea.sflag [#allocation4], %s1464_s7 }
 0x3a2   : > { %p1768_p2 = pnand %p1778_p11, %p2890_p1 }
 0x3a4   : > { %2135 = dma.done.wait (!%p1768_p2), %s1465_s8, 2048  }
 0x3a5   : > { %2137 = vsyncadd (!%p1768_p2), %s1465_s8, 4294965248  ;;  %p19_p4 = scmp.ge.s32.totalorder %s2329_s10, 6   ;;  %s2891_s15 = smov %s2144_s16 }
 0x3a6   : > { %s2892_s16 = smov %s2148_s17  ;;  %s2893_s17 = smov %s2339_s12 }
 0x3a7   : > { %s2894_s18 = smov %s2329_s10  ;;  %21 = sbr.rel (!%p19_p4) target bundleno = 7 (0x7), region = 93 }
 0x3ae   :  { %1470 = vsyncpa [#allocation3], 1 }
 0x3af   :  { %1472 = vsyncpa [#allocation3 + $0x1], 1 }
 0x3b0   :  { %1473 = vsyncpa [#allocation6], 1 }
 0x3b1   :  { %1474 = vsyncpa [#allocation9], 1 }
 0x3b2   :  { %1475 = vsyncpa [#allocation4], 1 }
 0x3b3   :  { %1477 = vsyncpa [#allocation4 + $0x1], 1 }

</bundles_post_ra>
